<compile_context>
chip_gen: v7x
topology: tpu7x:2x2x1
jax: 0.10.0
libtpu: 0.0.40
codegen_flags: <defaults>
</compile_context>

<pallas_src>
import functools

import jax
import jax.numpy as jnp
from jax import lax
from jax.experimental import pallas as pl
from jax.experimental.pallas import tpu as pltpu


_LANE_CHUNK = 512  # rows of x (= output lanes) handled per MXU call


def _log_linear_kernel(x_ref, w_ref, b_ref, o_ref, *, chunk, n_chunks):
    """One batch tile.

    x_ref: (tb, emb)          VMEM, pipelined (tb = n_chunks * chunk)
    w_ref: (8, emb)           VMEM, resident (8 identical weight rows)
    b_ref: (1, 1)             SMEM scalar bias
    o_ref: (n_chunks, chunk)  VMEM, lane-dense logits for this tile
    """
    bias = b_ref[0, 0]
    w_rows = w_ref[...]                                   # (8, emb)

    def matvec(xc):
        # NT matmul on the MXU: (8, emb) x (chunk, emb)^T -> (8, chunk).
        # Result is already lane-major, so the store is an unmasked dense vst.
        vals = lax.dot_general(
            w_rows, xc,
            dimension_numbers=(((1,), (1,)), ((), ())),
            preferred_element_type=jnp.float32)           # (8, chunk)
        return (vals[0:1, :] + bias).astype(o_ref.dtype)  # (1, chunk)

    if n_chunks == 1:
        o_ref[...] = matvec(x_ref[...])
    else:
        def body(c, carry):
            start = pl.multiple_of(c * chunk, chunk)
            o_ref[pl.ds(c, 1), :] = matvec(x_ref[pl.ds(start, chunk), :])
            return carry
        # Not unrolled: the kernel is HBM-read bound, loop overhead is hidden.
        lax.fori_loop(0, n_chunks, body, 0)


def _pick_batch_tile(batch, emb, itemsize):
    """Rows of x per grid step.

    Targets ~12 MiB of x per tile so the ~0.35 us/step pipeline overhead is
    <10% of the tile DMA even at v7x HBM bandwidth (~3.2 TB/s), while the
    double-buffered footprint (2 x-tiles + lane-dense output + weight) stays
    well under v7x's 64 MiB physical VMEM.  Guarantees >=2 grid steps whenever
    batch > 256 (pipelining + dual-TC sharding on v7x).
    """
    row_bytes = emb * itemsize
    target_rows = max(8, (12 * 1024 * 1024) // row_bytes)
    tb = min(target_rows, max(256, pl.cdiv(batch, 2)))
    if tb >= batch:
        return batch                       # single full-extent block (always legal)
    if tb >= _LANE_CHUNK:
        return (tb // _LANE_CHUNK) * _LANE_CHUNK   # aligned chunks, f32/bf16 safe
    return max(8, (tb // 8) * 8)


def log_linear_forward(x, w, b):
    """y = x @ w.T + b (LogLinear.forward).

    x: (batch, embedding_dim), w: (1, embedding_dim), b: (1,)
    returns: (batch, 1), dtype of x
    """
    batch, emb = x.shape
    itemsize = x.dtype.itemsize

    # Tiny parameters: cast/replicate freely (x itself is never copied).
    w_rows = jnp.broadcast_to(w.reshape(1, emb).astype(x.dtype), (8, emb))
    b2d = b.reshape(1, 1).astype(jnp.float32)

    tb = _pick_batch_tile(batch, emb, itemsize)
    num_tiles = pl.cdiv(batch, tb)
    chunk = _LANE_CHUNK if tb % _LANE_CHUNK == 0 else tb
    n_chunks = tb // chunk

    # Scoped VMEM actually needed (double-buffered x tile + lane-dense output
    # block + resident weight) plus headroom; explicit so v5e's 16 MiB default
    # never binds and v7x's 64 MiB physical is never exceeded.
    out_rows_padded = max(8, ((n_chunks + 7) // 8) * 8)
    vmem_needed = (2 * tb * emb * itemsize
                   + 2 * out_rows_padded * chunk * itemsize
                   + 2 * 8 * emb * itemsize
                   + (2 << 20))
    vmem_limit = int(min(64 << 20, max(32 << 20, vmem_needed)))

    kernel = functools.partial(_log_linear_kernel, chunk=chunk, n_chunks=n_chunks)

    out = pl.pallas_call(
        kernel,
        out_shape=jax.ShapeDtypeStruct((num_tiles, n_chunks, chunk), x.dtype),
        grid=(num_tiles,),
        in_specs=[
            pl.BlockSpec((tb, emb), lambda i: (i, 0)),              # x tile (pipelined)
            pl.BlockSpec((8, emb), lambda i: (0, 0)),               # weight rows (resident)
            pl.BlockSpec((1, 1), lambda i: (0, 0),
                         memory_space=pltpu.MemorySpace.SMEM),      # bias scalar
        ],
        out_specs=pl.BlockSpec((None, n_chunks, chunk), lambda i: (i, 0, 0)),
        compiler_params=pltpu.CompilerParams(
            dimension_semantics=("parallel",),   # independent tiles: dual-TC on v7x
            vmem_limit_bytes=vmem_limit,
        ),
    )(x, w_rows, b2d)

    # Lane-dense (num_tiles, n_chunks, chunk) -> (batch, 1); drops the garbage
    # lanes of a partial last tile (op is per-row, so they never contaminate).
    y = out.reshape(num_tiles * tb)
    if num_tiles * tb != batch:
        y = y[:batch]
    return y.reshape(batch, 1)


def log_linear_predict(x, w, b):
    """PyTorch `predict()` equivalent: sigmoid applied outside the kernel."""
    return jax.nn.sigmoid(log_linear_forward(x, w, b))


if __name__ == "__main__":
    key = jax.random.PRNGKey(0)
    kx, kw, kb, k2 = jax.random.split(key, 4)

    # Small shapes consistent with the module (sentence embeddings -> 1 logit).
    batch, embedding_dim = 8, 32
    x = jax.random.normal(kx, (batch, embedding_dim), dtype=jnp.float32)
    w = jax.random.normal(kw, (1, embedding_dim), dtype=jnp.float32) * 0.1
    b = jax.random.normal(kb, (1,), dtype=jnp.float32) * 0.1

    y = jax.block_until_ready(log_linear_forward(x, w, b))
    y_ref = x @ w.T + b
    assert y.shape == (batch, 1)
    assert jnp.allclose(y, y_ref, atol=1e-5, rtol=1e-5)

    # Second check: multi-tile grid, lane-dense store path, partial last tile.
    k2x, k2w, k2b = jax.random.split(k2, 3)
    batch2, emb2 = 1300, 256
    x2 = jax.random.normal(k2x, (batch2, emb2), dtype=jnp.float32)
    w2 = jax.random.normal(k2w, (1, emb2), dtype=jnp.float32) * 0.05
    b2 = jax.random.normal(k2b, (1,), dtype=jnp.float32) * 0.05
    y2 = jax.block_until_ready(log_linear_forward(x2, w2, b2))
    y2_ref = x2 @ w2.T + b2
    assert y2.shape == (batch2, 1)
    assert jnp.allclose(y2, y2_ref, atol=1e-4, rtol=1e-4)

    # forward() returns pre-sigmoid logits; predict() applies sigmoid outside
    # the kernel, matching the PyTorch module.
    _ = jax.block_until_ready(log_linear_predict(x, w, b))

    print("KERNEL_OK")
</pallas_src>

<mosaic_0001>
module attributes {stable_mosaic.version = 11 : i64} {
  func.func @_log_linear_kernel(%arg0: i32, %arg1: memref<8x32xf32, #tpu.memory_space<vmem>>, %arg2: memref<8x32xf32, #tpu.memory_space<vmem>>, %arg3: memref<1x1xf32, #tpu.memory_space<smem>>, %arg4: memref<1x1x8xf32, #tpu.memory_space<vmem>>) attributes {dimension_semantics = [#tpu.dimension_semantics<parallel>], iteration_bounds = array<i64: 1>, scalar_prefetch = 0 : i64, scratch_operands = 0 : i64, tpu.core_type = #tpu.core_type<tc>, window_params = [{transform_indices = @transform_0, window_bounds = array<i64: 8, 32>}, {pipeline_mode = #tpu.pipeline_mode<synchronous>, transform_indices = @transform_1, window_bounds = array<i64: 8, 32>}, {transform_indices = @transform_2, window_bounds = array<i64: 1, 1>}, {transform_indices = @transform_3, window_bounds = array<i64: 1, 1, 8>}]} {
    %c0 = arith.constant 0 : index
    %c0_0 = arith.constant 0 : index
    %0 = memref.load %arg3[%c0, %c0_0] : memref<1x1xf32, #tpu.memory_space<smem>>
    %c0_1 = arith.constant 0 : index
    %c0_2 = arith.constant 0 : index
    %1 = vector.load %arg2[%c0_1, %c0_2] : memref<8x32xf32, #tpu.memory_space<vmem>>, vector<8x32xf32>
    %c0_3 = arith.constant 0 : index
    %c0_4 = arith.constant 0 : index
    %2 = vector.load %arg1[%c0_3, %c0_4] : memref<8x32xf32, #tpu.memory_space<vmem>>, vector<8x32xf32>
    %cst = arith.constant dense<0.000000e+00> : vector<8x8xf32>
    %3 = tpu.matmul %1, %2, %cst {dimension_numbers = #tpu.dot_dimension_numbers<[1], [1], [0], [0], [0, 0, 1, 0], [], []>} : vector<8x32xf32>, vector<8x32xf32>, vector<8x8xf32> -> vector<8x8xf32>
    %4 = vector.extract_strided_slice %3 {offsets = [0, 0], sizes = [1, 8], strides = [1, 1]} : vector<8x8xf32> to vector<1x8xf32>
    %5 = vector.broadcast %0 : f32 to vector<1x8xf32>
    %6 = arith.addf %4, %5 : vector<1x8xf32>
    %c0_5 = arith.constant 0 : index
    %c0_6 = arith.constant 0 : index
    %c0_7 = arith.constant 0 : index
    %7 = vector.load %arg4[%c0_5, %c0_6, %c0_7] : memref<1x1x8xf32, #tpu.memory_space<vmem>>, vector<1x1x8xf32>
    %8 = vector.shape_cast %7 : vector<1x1x8xf32> to vector<1x8xf32>
    %9 = vector.shape_cast %6 : vector<1x8xf32> to vector<1x1x8xf32>
    tpu.vector_store %arg4[%c0_5, %c0_6, %c0_7], %9 {strides = array<i32>} : memref<1x1x8xf32, #tpu.memory_space<vmem>>, vector<1x1x8xf32>,
    return
  }
  func.func @transform_0(%arg0: i32) -> (i32, i32) {
    %c0_i32 = arith.constant 0 : i32
    %c0_i32_0 = arith.constant 0 : i32
    return %arg0, %c0_i32 : i32, i32
  }
  func.func @transform_1(%arg0: i32) -> (i32, i32) {
    %c0_i32 = arith.constant 0 : i32
    %c0_i32_0 = arith.constant 0 : i32
    %c0_i32_1 = arith.constant 0 : i32
    return %c0_i32, %c0_i32_0 : i32, i32
  }
  func.func @transform_2(%arg0: i32) -> (i32, i32) {
    %c0_i32 = arith.constant 0 : i32
    %c0_i32_0 = arith.constant 0 : i32
    %c0_i32_1 = arith.constant 0 : i32
    return %c0_i32, %c0_i32_0 : i32, i32
  }
  func.func @transform_3(%arg0: i32) -> (i32, i32, i32) {
    %c0_i32 = arith.constant 0 : i32
    %c0_i32_0 = arith.constant 0 : i32
    %c0_i32_1 = arith.constant 0 : i32
    return %arg0, %c0_i32, %c0_i32_0 : i32, i32, i32
  }
}

</mosaic_0001>

<bundles_post_ra>
// kernel: tpu_custom_call.1
= control target key start
LH: loop header
LB: loop body
LE: loop exit
PB: predicated region body
PF: predicated region fallthrough
CT: control target
= control target key end

     0   :  { %9 = vsyncpa [#allocation4], 0  ;;  %s290_s0 = inlined_call_operand.hbm [shape: f32[8,32], index: 0, kind: input, shape index: {}]   ;;  %s291_s1 = inlined_call_operand.hbm [shape: f32[8,32], index: 1, kind: input, shape index: {}]   ;;  %s292_s2 = inlined_call_operand.<no memory space> [shape: f32[1,1], index: 2, kind: input, shape index: {}]   ;;  %s293_s3 = inlined_call_operand.hbm [shape: f32[1,1,8], index: 3, kind: output, shape index: {}]  }
   0x1   :  { %10 = vsyncpa [#allocation7], 0 }
   0x2   :  { %11 = vsyncpa [#allocation5], 0  ;;  %s226_s12 = smov [#allocation3]   ;;  %s227_s14 = smov [#allocation6]  }
   0x3   :  { %s18_s13 = sshll.u32 %s226_s12, 4  ;;  %s28_s15 = sshll.u32 %s227_s14, 4  ;;  %s19_s13 = int_to_ptr.vmem [resolvable:$true] %s18_s13  ;;  %s29_s15 = int_to_ptr.vmem [resolvable:$true] %s28_s15 }
   0x4   :  { %s154_s18 = scalar_lea.hbm %s290_s0, 128 }
   0x5   :  { %p155_p0 = scmp.ne.s32.totalorder %s290_s0, %s154_s18  ;;  %p158_p1 = scmp.lt.u32.totalorder %s154_s18, %s290_s0 }
   0x7   :  { %p160_p2 = pnand %p158_p1, %p155_p0 }
   0x9   :  { %163 = shalt.err (!%p160_p2)
}
   0xa   :  { %s164_s23 = scalar_lea.vmem %s19_s13, 128  ;;  %p169_p4 = scmp.lt.s32.totalorder %s19_s13, %s19_s13 }
   0xb   :  { %p165_p3 = scmp.ne.s32.totalorder %s19_s13, %s164_s23  ;;  %p170_p5 = scmp.lt.s32.totalorder %s164_s23, %s164_s23 }
   0xd   :  { %p171_p6 = por %p170_p5, %p169_p4 }
   0xf   :  { %p172_p7 = pnand %p171_p6, %p165_p3 }
  0x11   :  { %175 = shalt.err (!%p172_p7)
}
  0x12   :  { %21 = dma.hbm_to_vmem [thread:$0]  %s290_s0, 128, %s19_s13, [#allocation4]  }
  0x13   :  { %s176_s28 = scalar_lea.hbm %s291_s1, 128 }
  0x14   :  { %p177_p8 = scmp.ne.s32.totalorder %s291_s1, %s176_s28  ;;  %p180_p9 = scmp.lt.u32.totalorder %s176_s28, %s291_s1 }
  0x16   :  { %p182_p10 = pnand %p180_p9, %p177_p8 }
  0x18   :  { %185 = shalt.err (!%p182_p10)
}
  0x19   :  { %s186_s6 = scalar_lea.vmem %s29_s15, 128  ;;  %p191_p12 = scmp.lt.s32.totalorder %s29_s15, %s29_s15 }
  0x1a   :  { %p187_p11 = scmp.ne.s32.totalorder %s29_s15, %s186_s6  ;;  %p192_p13 = scmp.lt.s32.totalorder %s186_s6, %s186_s6 }
  0x1c   :  { %p193_p0 = por %p192_p13, %p191_p12 }
  0x1e   :  { %p194_p1 = pnand %p193_p0, %p187_p11 }
  0x20   :  { %197 = shalt.err (!%p194_p1)
}
  0x21   :  { %31 = dma.hbm_to_vmem [thread:$0]  %s291_s1, 128, %s29_s15, [#allocation7]  }
  0x22   :  { %220 = dma.done.wait [#allocation4], 128  }
  0x23   :  { %221 = vsyncadd [#allocation4], 4294967168 }
  0x24   :  { %222 = dma.done.wait [#allocation7], 128  }
  0x25   :  { %223 = vsyncadd [#allocation7], 4294967168  ;;  %v228_v0 = vmov 0.0   ;;  %vm229_vm0 = vmmov 0   ;;  %vm43_vm1 = vcmask 261120   ;;  %v42_v1 = vld [vmem:[#allocation3] sm:$0xff]  ;;  %v120_v3 = vstv %s292_s2 }
  0x26   :  { %144 = vmatprep.subr.mxu0 %v228_v0  ;;  %146 = vmatprep.mubr.msk.f32.mxu0 %vm229_vm0, %v228_v0  ;;  %v41_v2 = vld [vmem:[#allocation6] sm:$0xff]  ;;  %s230_s10 = smov [#allocation8]   ;;  %vm122_vm2 = vcmask 57344  }
  0x27   :  { %145 = vmatpush3.xpose.msk.msra.mxu0 %vm43_vm1, %v42_v1  ;;  %s130_s11 = sshll.u32 %s230_s10, 4  ;;  %s131_s11 = int_to_ptr.vmem [resolvable:$true] %s130_s11 }
  0x28   :  { %s198_s1 = scalar_lea.vmem %s131_s11, 16  ;;  %s202_s12 = scalar_lea.vmem %s131_s11, 32 }
  0x29   :  { %p199_p2 = scmp.ne.s32.totalorder %s131_s11, %s198_s1  ;;  %p203_p3 = scmp.lt.s32.totalorder %s131_s11, %s131_s11 }
  0x2a   :  { %147 = vmatmul.mubr.msk.f32.vlgmr.msra.gmra.mrb[0].mxu0 %vm43_vm1, %v41_v2  ;;  %p204_p4 = scmp.lt.s32.totalorder %s202_s12, %s198_s1 }
  0x2c   :  { %p205_p5 = por %p204_p4, %p203_p3 }
  0x2e   :  { %p206_p6 = pnand %p205_p5, %p199_p2 }
  0xfd   :  { %v116_v4 = vpop.f32.mrb[0].mxu0 }
  0xfe   :  { %v121_v5 = vadd.f32 %v120_v3, %v116_v4  ;;  %v148_v6 = vpop.f32.mrb[1].mxu0 }
 0x100   :  { %123 = vst.msk [vmem:[#allocation8] sm:$0x1] %vm122_vm2, %v121_v5 }
 0x101   :  { %209 = shalt.err (!%p206_p6)
}
 0x102   :  { %s210_s2 = scalar_lea.hbm %s293_s3, 16 }
 0x103   :  { %p211_p7 = scmp.ne.s32.totalorder %s293_s3, %s210_s2  ;;  %p214_p8 = scmp.lt.u32.totalorder %s210_s2, %s293_s3 }
 0x105   :  { %p216_p9 = pnand %p214_p8, %p211_p7 }
 0x107   :  { %219 = shalt.err (!%p216_p9)
}
 0x108   :  { %133 = dma.vmem_to_hbm [thread:$0]  %s131_s11, 16, %s293_s3, [#allocation5]  }
 0x109   :  { %224 = dma.done.wait [#allocation5], 16  }
 0x10a   :  { %225 = vsyncadd [#allocation5], 4294967280 }
 0x10b   :  { %137 = vsyncpa [#allocation4], 1 }
 0x10c   :  { %138 = vsyncpa [#allocation7], 1 }
 0x10d   :  { %139 = vsyncpa [#allocation5], 1 }

</bundles_post_ra>
